<compile_context>
chip_gen: v7x
topology: tpu7x:2x2x1
jax: 0.10.0
libtpu: 0.0.40
codegen_flags: <defaults>
</compile_context>

<pallas_src>
import functools

import jax
import jax.numpy as jnp
from jax.experimental import pallas as pl
from jax.experimental.pallas import tpu as pltpu


def _softplus(x):
    # Numerically stable softplus matching torch.nn.functional.softplus.
    return jnp.maximum(x, 0.0) + jnp.log1p(jnp.exp(-jnp.abs(x)))


def _round_up(a, b):
    return ((a + b - 1) // b) * b


def s6_kernel(x_ref, w_ref, b_ref, sel_ref, y_ref, *, d, n, p):
    """One row-tile of the fused S6 forward (p logical rows per physical row).

    x_ref   : (tm, p*d)        f32, p logical rows packed per 128-lane row
    w_ref   : (p*d, p*(d+2n))  bf16 block-diagonal packed [fc1 | fc2 | fc3]
    b_ref   : (1,  p*(d+2n))   f32 packed bias
    sel_ref : (2*p*n, p*d)     f32 0/1 selector (per-row sum + lane broadcast)
    y_ref   : (tm, p*d)        output, same packing as x_ref
    """
    pd = p * d
    pn = p * n

    x = x_ref[...]                                           # (tm, p*d) f32

    # One fused MXU matmul against the block-diagonal packed weight:
    #   cols [0, p*d)           -> delta_pre, lane-aligned with x_packed
    #   cols [p*d, p*d + p*n)   -> B blocks (one n-wide block per logical row)
    #   cols [p*d + p*n, cols)  -> C blocks (same ordering)
    # bf16 operands, f32 accumulation, f32 bias added afterwards.
    proj = jnp.dot(x.astype(w_ref.dtype), w_ref[...],
                   preferred_element_type=jnp.float32) + b_ref[...]

    delta = _softplus(proj[:, :pd])                          # (tm, p*d)

    bc_in = proj[:, pd:pd + 2 * pn]                          # (tm, 2*p*n) = [B | C]
    # Half-width lane rotation aligns row-j C values with row-j B lanes.
    # shift == half the slab width, so the rotation direction is irrelevant.
    aligned = pltpu.roll(bc_in, shift=pn, axis=1)
    prod = bc_in * aligned                                   # B_j[k]*C_j[k] at B lanes

    # Tiny 0/1 matmul: sum the n products of each logical row and broadcast the
    # scalar across that row's d output lanes (garbage C-lane products select 0).
    bc = jnp.dot(prod, sel_ref[...],
                 preferred_element_type=jnp.float32)         # (tm, p*d)

    # y = x * softplus(fc1(x)) * sum_n fc2(x)*fc3(x)   (dA*h0 term == 0)
    y_ref[...] = (x * delta * bc).astype(y_ref.dtype)


def s6_forward(x, params, *, tile_rows=2048, compute_dtype=jnp.bfloat16):
    """x: (batch, seq_len, model_dim) f32 -> y of same shape (zero initial h)."""
    bsz, seq_len, d = x.shape
    n = params["w2t"].shape[1]
    m = bsz * seq_len

    # Lane-dense packing factor: p logical rows per 128-lane physical row.
    p = (128 // d) if (d < 128 and 128 % d == 0) else 1
    pd, pn = p * d, p * n
    cols = pd + 2 * pn

    # ---- pack inputs: contiguous reshape (free); pad at most p-1 zero rows ----
    x2 = x.reshape(m, d).astype(jnp.float32)
    m_p = _round_up(m, p)
    if m_p != m:
        x2 = jnp.pad(x2, ((0, m_p - m), (0, 0)))     # <= p-1 rows, negligible
    m4 = m_p // p
    x_packed = x2.reshape(m4, pd)                    # (m/p, 128) lane-dense view

    # ---- block-diagonal packed weight / bias / 0-1 selector (built once) ----
    w1t = params["w1t"].astype(jnp.float32)          # (d, d)
    w2t = params["w2t"].astype(jnp.float32)          # (d, n)
    w3t = params["w3t"].astype(jnp.float32)          # (d, n)
    w_delta = jnp.zeros((pd, pd), jnp.float32)
    w_b = jnp.zeros((pd, pn), jnp.float32)
    w_c = jnp.zeros((pd, pn), jnp.float32)
    sel = jnp.zeros((2 * pn, pd), jnp.float32)
    for j in range(p):
        w_delta = w_delta.at[d * j:d * (j + 1), d * j:d * (j + 1)].set(w1t)
        w_b = w_b.at[d * j:d * (j + 1), n * j:n * (j + 1)].set(w2t)
        w_c = w_c.at[d * j:d * (j + 1), n * j:n * (j + 1)].set(w3t)
        sel = sel.at[n * j:n * (j + 1), d * j:d * (j + 1)].set(1.0)
    wbd = jnp.concatenate([w_delta, w_b, w_c], axis=1).astype(compute_dtype)
    bbd = jnp.concatenate(
        [jnp.tile(params["b1"], (1, p)),
         jnp.tile(params["b2"], (1, p)),
         jnp.tile(params["b3"], (1, p))], axis=1).astype(jnp.float32)

    # ---- tile selection (packed rows) ----
    # Keep the double-buffered x/y tiles within ~8 MiB of VMEM.
    max_tm_vmem = max(8, (((8 << 20) // (16 * pd)) // 8) * 8)
    if m4 <= 8:
        tm = m4                                      # single block == full array dim
    else:
        # >= 2 grid steps so v7x's two TensorCores both get work.
        cap = _round_up(pl.cdiv(m4, 2), 8)
        tm = max(8, min(_round_up(int(tile_rows), 8), cap, max_tm_vmem))
    grid = (pl.cdiv(m4, tm),)                        # ragged last block is fine:
                                                     # per-row math, OOB rows discarded

    row_spec = pl.BlockSpec((tm, pd), lambda i: (i, 0))

    # Advisory scheduler hint.
    flops = 2 * m4 * pd * cols + 2 * m4 * (2 * pn) * pd + 8 * m4 * pd
    transcendentals = 2 * m4 * pd                    # exp + log1p in softplus
    bytes_accessed = (2 * m4 * pd * 4                # x in, y out (f32)
                      + pd * cols * jnp.dtype(compute_dtype).itemsize
                      + cols * 4 + 2 * pn * pd * 4)

    y_packed = pl.pallas_call(
        functools.partial(s6_kernel, d=d, n=n, p=p),
        out_shape=jax.ShapeDtypeStruct((m4, pd), x.dtype),
        grid_spec=pltpu.PrefetchScalarGridSpec(
            num_scalar_prefetch=0,
            grid=grid,
            in_specs=[
                row_spec,                                      # packed x rows
                pl.BlockSpec((pd, cols), lambda i: (0, 0)),    # packed weights (bf16, resident)
                pl.BlockSpec((1, cols), lambda i: (0, 0)),     # packed bias (f32, resident)
                pl.BlockSpec((2 * pn, pd), lambda i: (0, 0)),  # 0/1 selector (f32, resident)
            ],
            out_specs=row_spec,
        ),
        compiler_params=pltpu.CompilerParams(
            dimension_semantics=("parallel",)),
        cost_estimate=pl.CostEstimate(
            flops=int(flops),
            transcendentals=int(transcendentals),
            bytes_accessed=int(bytes_accessed)),
    )(x_packed, wbd, bbd, sel)

    return y_packed.reshape(m_p, d)[:m].reshape(bsz, seq_len, d)


def init_params(key, model_dim, state_size):
    """Deterministic init mirroring nn.Linear defaults + xavier_uniform for A."""
    ks = jax.random.split(key, 7)

    def linear(kw, kb, fan_in, fan_out):
        bound = 1.0 / jnp.sqrt(fan_in)
        w = jax.random.uniform(kw, (fan_out, fan_in), jnp.float32, -bound, bound)
        b = jax.random.uniform(kb, (1, fan_out), jnp.float32, -bound, bound)
        return w, b

    w1, b1 = linear(ks[0], ks[1], model_dim, model_dim)   # fc1
    w2, b2 = linear(ks[2], ks[3], model_dim, state_size)  # fc2
    w3, b3 = linear(ks[4], ks[5], model_dim, state_size)  # fc3

    # A: present in the module but multiplied by the zero initial h, so it does
    # not influence y on this forward path.
    limit = jnp.sqrt(6.0 / (model_dim + state_size))
    a = jax.random.uniform(ks[6], (model_dim, state_size), jnp.float32, -limit, limit)

    return {
        "w1t": w1.T, "b1": b1,
        "w2t": w2.T, "b2": b2,
        "w3t": w3.T, "b3": b3,
        "A": a,
    }


def s6_reference(x, params, compute_dtype=jnp.float32):
    """Pure-JAX reference following the PyTorch code literally.

    `compute_dtype` casts the matmul operands (to mirror the kernel's bf16 MXU
    inputs when set to bfloat16); accumulation and everything else stay f32.
    """
    xc = x.astype(compute_dtype)

    def lin(wt, b):
        return jnp.dot(xc, wt.astype(compute_dtype),
                       preferred_element_type=jnp.float32) + b[0]

    b_proj = lin(params["w2t"], params["b2"])                  # (b, l, N)
    c_proj = lin(params["w3t"], params["b3"])                  # (b, l, N)
    delta = jax.nn.softplus(lin(params["w1t"], params["b1"]))  # (b, l, D)

    d_b = jnp.einsum("bld,bln->bldn", delta, b_proj)
    d_a = jnp.exp(jnp.einsum("bld,dn->bldn", delta, params["A"]))
    h0 = jnp.zeros_like(d_b)
    h = d_a * h0 + x[..., None] * d_b
    y = jnp.einsum("bln,bldn->bld", c_proj, h)
    return y


if __name__ == "__main__":
    batch_size = 2
    seq_len = 8
    model_dim = 32
    state_size = 16

    key = jax.random.PRNGKey(0)
    k_param, k_x, k_x2 = jax.random.split(key, 3)

    params = init_params(k_param, model_dim, state_size)

    # --- primary small-shape check (module-consistent shapes) ---
    x = jax.random.normal(k_x, (batch_size, seq_len, model_dim), jnp.float32)
    y = jax.block_until_ready(s6_forward(x, params))
    assert y.shape == (batch_size, seq_len, model_dim)
    assert not bool(jnp.any(jnp.isnan(y))), "NaN in kernel output"

    # Reference with the same bf16 matmul operand precision as the kernel.
    y_ref_matched = s6_reference(x, params, compute_dtype=jnp.bfloat16)
    assert jnp.allclose(y, y_ref_matched, rtol=1e-4, atol=1e-4), \
        "mismatch vs bf16-operand reference"

    # Loose sanity check vs exact f32 math (difference is only bf16 rounding).
    y_ref_f32 = s6_reference(x, params, compute_dtype=jnp.float32)
    max_abs = float(jnp.max(jnp.abs(y - y_ref_f32)))
    assert max_abs < 0.5, f"bf16 deviation unexpectedly large: {max_abs}"

    # --- secondary check exercising multi-step grid, ragged last block and the
    #     <= p-1 row pad (m = 3*50 = 150 -> 2 pad rows, 2 grid steps) ---
    x_b = jax.random.normal(k_x2, (3, 50, model_dim), jnp.float32)
    y_b = jax.block_until_ready(s6_forward(x_b, params))
    assert y_b.shape == x_b.shape
    assert not bool(jnp.any(jnp.isnan(y_b))), "NaN in kernel output (tiled case)"
    y_b_ref = s6_reference(x_b, params, compute_dtype=jnp.bfloat16)
    assert jnp.allclose(y_b, y_b_ref, rtol=2e-4, atol=2e-4), \
        "mismatch vs bf16-operand reference (tiled case)"

    print("KERNEL_OK")
</pallas_src>

<mosaic_0001>
module attributes {stable_mosaic.version = 11 : i64} {
  func.func @s6_kernel(%arg0: i32, %arg1: memref<4x128xf32, #tpu.memory_space<vmem>>, %arg2: memref<128x256xbf16, #tpu.memory_space<vmem>>, %arg3: memref<1x256xf32, #tpu.memory_space<vmem>>, %arg4: memref<128x128xf32, #tpu.memory_space<vmem>>, %arg5: memref<4x128xf32, #tpu.memory_space<vmem>>) attributes {dimension_semantics = [#tpu.dimension_semantics<parallel>], iteration_bounds = array<i64: 1>, scalar_prefetch = 0 : i64, scratch_operands = 0 : i64, tpu.core_type = #tpu.core_type<tc>, window_params = [{transform_indices = @transform_0, window_bounds = array<i64: 4, 128>}, {pipeline_mode = #tpu.pipeline_mode<synchronous>, transform_indices = @transform_1, window_bounds = array<i64: 128, 256>}, {pipeline_mode = #tpu.pipeline_mode<synchronous>, transform_indices = @transform_2, window_bounds = array<i64: 1, 256>}, {pipeline_mode = #tpu.pipeline_mode<synchronous>, transform_indices = @transform_3, window_bounds = array<i64: 128, 128>}, {transform_indices = @transform_4, window_bounds = array<i64: 4, 128>}]} {
    %c0 = arith.constant 0 : index
    %c0_0 = arith.constant 0 : index
    %0 = vector.load %arg1[%c0, %c0_0] : memref<4x128xf32, #tpu.memory_space<vmem>>, vector<4x128xf32>
    %1 = arith.truncf %0 : vector<4x128xf32> to vector<4x128xbf16>
    %c0_1 = arith.constant 0 : index
    %c0_2 = arith.constant 0 : index
    %2 = vector.load %arg2[%c0_1, %c0_2] : memref<128x256xbf16, #tpu.memory_space<vmem>>, vector<128x256xbf16>
    %cst = arith.constant dense<0.000000e+00> : vector<4x256xf32>
    %3 = tpu.matmul %1, %2, %cst {dimension_numbers = #tpu.dot_dimension_numbers<[1], [0], [0], [1], [0, 0, 1, 1], [], []>} : vector<4x128xbf16>, vector<128x256xbf16>, vector<4x256xf32> -> vector<4x256xf32>
    %c0_3 = arith.constant 0 : index
    %c0_4 = arith.constant 0 : index
    %4 = vector.load %arg3[%c0_3, %c0_4] : memref<1x256xf32, #tpu.memory_space<vmem>>, vector<1x256xf32>
    %5 = vector.broadcast %4 : vector<1x256xf32> to vector<4x256xf32>
    %6 = arith.addf %3, %5 : vector<4x256xf32>
    %7 = vector.extract_strided_slice %6 {offsets = [0, 0], sizes = [4, 128], strides = [1, 1]} : vector<4x256xf32> to vector<4x128xf32>
    %cst_5 = arith.constant 0.000000e+00 : f32
    %8 = vector.broadcast %cst_5 : f32 to vector<4x128xf32>
    %9 = arith.maximumf %7, %8 : vector<4x128xf32>
    %10 = math.absf %7 : vector<4x128xf32>
    %cst_6 = arith.constant 0.000000e+00 : f32
    %11 = vector.broadcast %cst_6 : f32 to vector<4x128xf32>
    %12 = arith.subf %11, %10 : vector<4x128xf32>
    %13 = math.exp %12 : vector<4x128xf32>
    %14 = math.log1p %13 : vector<4x128xf32>
    %15 = arith.addf %9, %14 : vector<4x128xf32>
    %16 = vector.extract_strided_slice %6 {offsets = [0, 128], sizes = [4, 128], strides = [1, 1]} : vector<4x256xf32> to vector<4x128xf32>
    %c64_i32 = arith.constant 64 : i32
    %17 = tpu.dynamic_rotate %16 by %c64_i32 dim 1 : vector<4x128xf32>, i32 -> vector<4x128xf32>
    %18 = arith.mulf %16, %17 : vector<4x128xf32>
    %c0_7 = arith.constant 0 : index
    %c0_8 = arith.constant 0 : index
    %19 = vector.load %arg4[%c0_7, %c0_8] : memref<128x128xf32, #tpu.memory_space<vmem>>, vector<128x128xf32>
    %cst_9 = arith.constant dense<0.000000e+00> : vector<4x128xf32>
    %20 = tpu.matmul %18, %19, %cst_9 {dimension_numbers = #tpu.dot_dimension_numbers<[1], [0], [0], [1], [0, 0, 1, 1], [], []>} : vector<4x128xf32>, vector<128x128xf32>, vector<4x128xf32> -> vector<4x128xf32>
    %21 = arith.mulf %0, %15 : vector<4x128xf32>
    %22 = arith.mulf %21, %20 : vector<4x128xf32>
    %c0_10 = arith.constant 0 : index
    %c0_11 = arith.constant 0 : index
    %23 = vector.load %arg5[%c0_10, %c0_11] : memref<4x128xf32, #tpu.memory_space<vmem>>, vector<4x128xf32>
    tpu.vector_store %arg5[%c0_10, %c0_11], %22 {strides = array<i32>} : memref<4x128xf32, #tpu.memory_space<vmem>>, vector<4x128xf32>,
    return
  }
  func.func @transform_0(%arg0: i32) -> (i32, i32) {
    %c0_i32 = arith.constant 0 : i32
    %c0_i32_0 = arith.constant 0 : i32
    return %arg0, %c0_i32 : i32, i32
  }
  func.func @transform_1(%arg0: i32) -> (i32, i32) {
    %c0_i32 = arith.constant 0 : i32
    %c0_i32_0 = arith.constant 0 : i32
    %c0_i32_1 = arith.constant 0 : i32
    return %c0_i32, %c0_i32_0 : i32, i32
  }
  func.func @transform_2(%arg0: i32) -> (i32, i32) {
    %c0_i32 = arith.constant 0 : i32
    %c0_i32_0 = arith.constant 0 : i32
    %c0_i32_1 = arith.constant 0 : i32
    return %c0_i32, %c0_i32_0 : i32, i32
  }
  func.func @transform_3(%arg0: i32) -> (i32, i32) {
    %c0_i32 = arith.constant 0 : i32
    %c0_i32_0 = arith.constant 0 : i32
    %c0_i32_1 = arith.constant 0 : i32
    return %c0_i32, %c0_i32_0 : i32, i32
  }
  func.func @transform_4(%arg0: i32) -> (i32, i32) {
    %c0_i32 = arith.constant 0 : i32
    %c0_i32_0 = arith.constant 0 : i32
    return %arg0, %c0_i32 : i32, i32
  }
}

</mosaic_0001>

<bundles_post_ra>
// kernel: tpu_custom_call.1
= control target key start
LH: loop header
LB: loop body
LE: loop exit
PB: predicated region body
PF: predicated region fallthrough
CT: control target
= control target key end

     0   :  { %9 = vsyncpa [#allocation3], 0  ;;  %s655_s0 = inlined_call_operand.hbm [shape: f32[4,128], index: 0, kind: input, shape index: {}]   ;;  %s656_s1 = inlined_call_operand.hbm [shape: bf16[128,256], index: 1, kind: input, shape index: {}]   ;;  %s657_s2 = inlined_call_operand.vmem [shape: f32[1,256], index: 2, kind: input, shape index: {}]   ;;  %s658_s3 = inlined_call_operand.hbm [shape: f32[128,128], index: 3, kind: input, shape index: {}]   ;;  %s659_s4 = inlined_call_operand.hbm [shape: f32[4,128], index: 4, kind: output, shape index: {}]  }
   0x1   :  { %10 = vsyncpa [#allocation6], 0 }
   0x2   :  { %11 = vsyncpa [#allocation4], 0  ;;  %s557_s15 = smov [#allocation5]   ;;  %s463_s19 = scalar_lea.hbm %s656_s1, 2048 }
   0x3   :  { %s27_s16 = sshll.u32 %s557_s15, 4  ;;  %p464_p0 = scmp.ne.s32.totalorder %s656_s1, %s463_s19  ;;  %s28_s16 = int_to_ptr.vmem [resolvable:$true] %s27_s16 }
   0x4   :  { %p467_p1 = scmp.lt.u32.totalorder %s463_s19, %s656_s1 }
   0x6   :  { %p469_p2 = pnand %p467_p1, %p464_p0 }
   0x8   :  { %472 = shalt.err (!%p469_p2)
}
   0x9   :  { %s473_s24 = scalar_lea.vmem %s28_s16, 2048  ;;  %p478_p4 = scmp.lt.s32.totalorder %s28_s16, %s28_s16 }
   0xa   :  { %p474_p3 = scmp.ne.s32.totalorder %s28_s16, %s473_s24  ;;  %p479_p5 = scmp.lt.s32.totalorder %s473_s24, %s473_s24 }
   0xc   :  { %p480_p6 = por %p479_p5, %p478_p4 }
   0xe   :  { %p481_p7 = pnand %p480_p6, %p474_p3 }
  0x10   :  { %484 = shalt.err (!%p481_p7)
}
  0x11   :  { %s558_s25 = smov 128   ;;  %s559_s26 = smov 8  }
  0x12   :  { %33 = dma.hbm_to_vmem [thread:$0]  %s656_s1, 2048, %s28_s16, [#allocation6], %s558_s25, %s558_s25, %s559_s26  }
  0x13   :  { %s560_s29 = smov [#allocation2]   ;;  %s561_s5 = smov [#allocation7]  }
  0x14   :  { %s18_s30 = sshll.u32 %s560_s29, 4  ;;  %s41_s6 = sshll.u32 %s561_s5, 4  ;;  %s19_s30 = int_to_ptr.vmem [resolvable:$true] %s18_s30  ;;  %s42_s6 = int_to_ptr.vmem [resolvable:$true] %s41_s6 }
  0x15   :  { %s485_s9 = scalar_lea.hbm %s655_s0, 64 }
  0x16   :  { %p486_p8 = scmp.ne.s32.totalorder %s655_s0, %s485_s9  ;;  %p489_p9 = scmp.lt.u32.totalorder %s485_s9, %s655_s0 }
  0x18   :  { %p491_p10 = pnand %p489_p9, %p486_p8 }
  0x1a   :  { %494 = shalt.err (!%p491_p10)
}
  0x1b   :  { %s495_s1 = scalar_lea.vmem %s19_s30, 64  ;;  %p500_p12 = scmp.lt.s32.totalorder %s19_s30, %s19_s30 }
  0x1c   :  { %p496_p11 = scmp.ne.s32.totalorder %s19_s30, %s495_s1  ;;  %p501_p13 = scmp.lt.s32.totalorder %s495_s1, %s495_s1 }
  0x1e   :  { %p502_p0 = por %p501_p13, %p500_p12 }
  0x20   :  { %p503_p1 = pnand %p502_p0, %p496_p11 }
  0x22   :  { %506 = shalt.err (!%p503_p1)
}
  0x23   :  { %21 = dma.hbm_to_vmem [thread:$0]  %s655_s0, 64, %s19_s30, [#allocation3]  }
  0x24   :  { %s507_s18 = scalar_lea.hbm %s658_s3, 2048 }
  0x25   :  { %p508_p2 = scmp.ne.s32.totalorder %s658_s3, %s507_s18  ;;  %p511_p3 = scmp.lt.u32.totalorder %s507_s18, %s658_s3 }
  0x27   :  { %p513_p4 = pnand %p511_p3, %p508_p2 }
  0x29   :  { %516 = shalt.err (!%p513_p4)
}
  0x2a   :  { %s517_s23 = scalar_lea.vmem %s42_s6, 2048  ;;  %p522_p6 = scmp.lt.s32.totalorder %s42_s6, %s42_s6 }
  0x2b   :  { %p518_p5 = scmp.ne.s32.totalorder %s42_s6, %s517_s23  ;;  %p523_p7 = scmp.lt.s32.totalorder %s517_s23, %s517_s23 }
  0x2d   :  { %p524_p8 = por %p523_p7, %p522_p6 }
  0x2f   :  { %p525_p9 = pnand %p524_p8, %p518_p5 }
  0x31   :  { %528 = shalt.err (!%p525_p9)
}
  0x32   :  { %47 = dma.hbm_to_vmem [thread:$0]  %s658_s3, 2048, %s42_s6, [#allocation6], %s558_s25, %s558_s25, %s559_s26  }
  0x33   :  { %551 = dma.done.wait [#allocation3], 64  }
  0x34   :  { %552 = vsyncadd [#allocation3], 4294967232 }
  0x35   :  { %553 = dma.done.wait [#allocation6], 4096  }
  0x36   :  { %554 = vsyncadd [#allocation6], 4294963200  ;;  %v562_v0 = vmov 0   ;;  %v435_v1 = vld [vmem:[#allocation5 + $0x4] ss:$8 sps:$4 sm:$0xff]   ;;  %v229_v21 = vld [vmem:[#allocation7 + $0x10] sm:$0xff]  ;;  %v78_v41 = vlaneseq }
  0x37   :  { %200 = vmatprep.mubr.bf16.mxu0 %v562_v0  ;;  %v437_v2 = vld [vmem:[#allocation5] ss:$8 sps:$4 sm:$0xff]   ;;  %168 = vmatprep.subr.bf16.mxu0 %v435_v1  ;;  %v438_v3 = vld [vmem:[#allocation5 + $0x14] ss:$8 sps:$4 sm:$0xff]   ;;  %v440_v4 = vld [vmem:[#allocation5 + $0x10] ss:$8 sps:$4 sm:$0xff]  }
  0x38   :  { %169 = vmatpush1.bf16.msra.mxu0 %v437_v2  ;;  %v441_v5 = vld [vmem:[#allocation5 + $0x24] ss:$8 sps:$4 sm:$0xff]   ;;  %v443_v6 = vld [vmem:[#allocation5 + $0x20] ss:$8 sps:$4 sm:$0xff]   ;;  %v444_v7 = vld [vmem:[#allocation5 + $0x34] ss:$8 sps:$4 sm:$0xff]  }
  0x39   :  { %170 = vmatprep.subr.bf16.mxu0 %v438_v3  ;;  %v446_v8 = vld [vmem:[#allocation5 + $0x30] ss:$8 sps:$4 sm:$0xff]   ;;  %v447_v9 = vld [vmem:[#allocation5 + $0x44] ss:$8 sps:$4 sm:$0xff]   ;;  %v449_v10 = vld [vmem:[#allocation5 + $0x40] ss:$8 sps:$4 sm:$0xff]  }
  0x3a   :  { %v450_v11 = vld [vmem:[#allocation5 + $0x54] ss:$8 sps:$4 sm:$0xff]   ;;  %v452_v12 = vld [vmem:[#allocation5 + $0x50] ss:$8 sps:$4 sm:$0xff]   ;;  %v453_v13 = vld [vmem:[#allocation5 + $0x64] ss:$8 sps:$4 sm:$0xff]  }
  0x3b   :  { %v455_v14 = vld [vmem:[#allocation5 + $0x60] ss:$8 sps:$4 sm:$0xff]   ;;  %v456_v15 = vld [vmem:[#allocation5 + $0x74] ss:$8 sps:$4 sm:$0xff]   ;;  %v458_v16 = vld [vmem:[#allocation5 + $0x70] ss:$8 sps:$4 sm:$0xff]  }
  0x3c   :  { %171 = vmatpush1.bf16.msra.mxu0 %v440_v4  ;;  %v635_v17 = vld [vmem:[#allocation2] sm:$0xf]  ;;  %v227_v19 = vld [vmem:[#allocation7] sm:$0xff]  ;;  %v228_v20 = vld [vmem:[#allocation7 + $0x8] sm:$0xff]  ;;  %v563_v22 = vmov 0.0|0.0   ;;  %v79_v45 = vshrl.u32 %v78_v41, 7 }
  0x3d   :  { %172 = vmatprep.subr.bf16.mxu0 %v441_v5  ;;  %v59_v18 = vpack.c.bf16 %v635_v17, %v635_v17  ;;  %400 = vmatprep.subr.bf16.mxu1 %v563_v22  ;;  %v401_v23 = vpack.c.bf16 %v228_v20, %v227_v19  ;;  %v230_v24 = vld [vmem:[#allocation7 + $0x18] sm:$0xff]  ;;  %v231_v26 = vld [vmem:[#allocation7 + $0x20] sm:$0xff]  ;;  %v232_v27 = vld [vmem:[#allocation7 + $0x28] sm:$0xff]  ;;  %vm564_vm0 = vmmov 0   ;;  %v565_v46 = vmov 0.0   ;;  %s566_s26 = smov 64  }
  0x3e   :  { %v404_v25 = vpack.c.bf16 %v230_v24, %v229_v21  ;;  %v407_v28 = vpack.c.bf16 %v232_v27, %v231_v26  ;;  %v233_v29 = vld [vmem:[#allocation7 + $0x30] sm:$0xff]  ;;  %v234_v30 = vld [vmem:[#allocation7 + $0x38] sm:$0xff]  ;;  %v235_v32 = vld [vmem:[#allocation7 + $0x40] sm:$0xff]  ;;  %397 = vmatprep.mubr.msk.f32.mxu1 %vm564_vm0, %v565_v46  ;;  %v84_v47 = vsub.s32 1, %v79_v45  ;;  %v80_v57 = vsub.s32 0, %v79_v45 }
  0x3f   :  { %402 = vmatpush3.bf16.msra.mxu1 %v401_v23  ;;  %v410_v31 = vpack.c.bf16 %v234_v30, %v233_v29  ;;  %v236_v33 = vld [vmem:[#allocation7 + $0x48] sm:$0xff]  ;;  %v237_v35 = vld [vmem:[#allocation7 + $0x50] sm:$0xff]  ;;  %v238_v36 = vld [vmem:[#allocation7 + $0x58] sm:$0xff] }
  0x40   :  { %173 = vmatpush1.bf16.msra.mxu0 %v443_v6  ;;  %403 = vmatprep.subr.bf16.mxu1 %v563_v22  ;;  %v413_v34 = vpack.c.bf16 %v236_v33, %v235_v32  ;;  %v416_v37 = vpack.c.bf16 %v238_v36, %v237_v35  ;;  %v239_v38 = vld [vmem:[#allocation7 + $0x60] sm:$0xff]  ;;  %v240_v39 = vld [vmem:[#allocation7 + $0x68] sm:$0xff]  ;;  %v241_v42 = vld [vmem:[#allocation7 + $0x70] sm:$0xff] }
  0x41   :  { %174 = vmatprep.subr.bf16.mxu0 %v444_v7  ;;  %v419_v40 = vpack.c.bf16 %v240_v39, %v239_v38  ;;  %v242_v43 = vld [vmem:[#allocation7 + $0x78] sm:$0xff] }
  0x42   :  { %v422_v44 = vpack.c.bf16 %v242_v43, %v241_v42  ;;  %v76_v48 = vld [vmem:[%s657_s2] sm:$0x3]  ;;  %s567_s2 = smov [#allocation8]  }
  0x43   :  { %405 = vmatpush3.bf16.msra.mxu1 %v404_v25  ;;  %v85_v49 = vrot.slane %v76_v48, %v84_v47  ;;  %v81_v58 = vrot.slane %v76_v48, %v80_v57  ;;  %s322_s27 = sshll.u32 %s567_s2, 4  ;;  %s323_s27 = int_to_ptr.vmem [resolvable:$true] %s322_s27 }
  0x44   :  { %175 = vmatpush1.bf16.msra.mxu0 %v446_v8  ;;  %406 = vmatprep.subr.bf16.mxu1 %v563_v22  ;;  %s529_s28 = scalar_lea.vmem %s323_s27, 64  ;;  %p534_p11 = scmp.lt.s32.totalorder %s323_s27, %s323_s27 }
  0x45   :  { %176 = vmatprep.subr.bf16.mxu0 %v447_v9  ;;  %p530_p10 = scmp.ne.s32.totalorder %s323_s27, %s529_s28  ;;  %p535_p12 = scmp.lt.s32.totalorder %s529_s28, %s529_s28 }
  0x47   :  { %408 = vmatpush3.bf16.msra.mxu1 %v407_v28  ;;  %p536_p13 = por %p535_p12, %p534_p11 }
  0x48   :  { %177 = vmatpush1.bf16.msra.mxu0 %v449_v10  ;;  %409 = vmatprep.subr.bf16.mxu1 %v563_v22 }
  0x49   :  { %178 = vmatprep.subr.bf16.mxu0 %v450_v11  ;;  %p537_p0 = pnand %p536_p13, %p530_p10 }
  0x4b   :  { %411 = vmatpush3.bf16.msra.mxu1 %v410_v31 }
  0x4c   :  { %179 = vmatpush1.bf16.msra.mxu0 %v452_v12  ;;  %412 = vmatprep.subr.bf16.mxu1 %v563_v22 }
  0x4d   :  { %180 = vmatprep.subr.bf16.mxu0 %v453_v13 }
  0x4f   :  { %414 = vmatpush3.bf16.msra.mxu1 %v413_v34 }
  0x50   :  { %181 = vmatpush1.bf16.msra.mxu0 %v455_v14  ;;  %415 = vmatprep.subr.bf16.mxu1 %v563_v22 }
  0x51   :  { %182 = vmatprep.subr.bf16.mxu0 %v456_v15 }
  0x53   :  { %417 = vmatpush3.bf16.msra.mxu1 %v416_v37 }
  0x54   :  { %183 = vmatpush1.bf16.msra.mxu0 %v458_v16  ;;  %418 = vmatprep.subr.bf16.mxu1 %v563_v22 }
  0x57   :  { %201 = vmatmul.mubr.bf16.vlgmr.msra.gmra.mrb[0].mxu0 %v59_v18  ;;  %420 = vmatpush3.bf16.msra.mxu1 %v419_v40 }
  0x58   :  { %421 = vmatprep.subr.bf16.mxu1 %v563_v22 }
  0x5b   :  { %423 = vmatpush3.bf16.msra.mxu1 %v422_v44 }
 0x12a   :  { %v202_v50 = vpop.f32.mrb[0].mxu0 }
 0x12b   :  { %v204_v51 = vpop.f32.mrb[1].mxu0  ;;  %v203_v59 = vadd.f32 %v202_v50, %v81_v58 }
 0x12c   :  { %v205_v52 = vadd.f32 %v204_v51, %v85_v49  ;;  %v206_v53 = vpop.f32.mrb[2].mxu0 }
 0x12d   :  { %v207_v54 = vpop.f32.mrb[3].mxu0  ;;  %v210_v60 = vand.u32 2147483647, %v203_v59  ;;  %v209_v8 = vmax.f32 %v203_v59, 0.0 }
 0x12e   :  { %224 = vrot.lane.b32.xlu0 %v205_v52, %s566_s26 }
 0x12f   :  { %v211_v61 = vsub.f32 0.0, %v210_v60 }
 0x131   :  { %v212_v62 = vmul.f32 1.442695, %v211_v61 }
 0x133   :  { %459 = vpow2.f32 %v212_v62 }
 0x13d   :  { %v460_v63 = vpop.eup %459 }
 0x13e   :  { %v214_v0 = vadd.f32 1.0, %v460_v63  ;;  %v217_v1 = vmul.f32 -0.5, %v460_v63  ;;  %v220_v4 = vand.u32 2147483647, %v460_v63 }
 0x140   :  { %461 = vlog2.f32 %v214_v0  ;;  %v218_v3 = vadd.f32 1.0, %v217_v1  ;;  %vm221_vm1 = vcmp.lt.f32.partialorder %v220_v4, 0.0004427343 }
 0x142   :  { %v219_v6 = vmul.f32 %v460_v63, %v218_v3 }
 0x14a   :  { %v462_v2 = vpop.eup %461 }
 0x14b   :  { %v216_v5 = vmul.f32 0.6931472, %v462_v2 }
 0x14d   :  { %v222_v7 = vsel %vm221_vm1, %v219_v6, %v216_v5 }
 0x14e   :  { %v223_v9 = vadd.f32 %v222_v7, %v209_v8 }
 0x150   :  { %v313_v10 = vmul.f32 %v223_v9, %v635_v17 }
 0x1a0   :  { %v225_v55 = vpop.permute.xlu0 %224 }
 0x1a1   :  { %v226_v56 = vmul.f32 %v225_v55, %v205_v52 }
 0x1a3   :  { %398 = vmatmul.mubr.f32.vlgmr.msra.gmra.mrb[0].mxu1 %v226_v56 }
 0x276   :  { %v309_v11 = vpop.f32.mrb[0].mxu1 }
 0x277   :  { %v314_v12 = vmul.f32 %v313_v10, %v309_v11  ;;  %v399_v13 = vpop.f32.mrb[1].mxu1 }
 0x279   :  { %315 = vst [vmem:[#allocation8] sm:$0xf] %v314_v12 }
 0x27a   :  { %540 = shalt.err (!%p537_p0)
}
 0x27b   :  { %s541_s5 = scalar_lea.hbm %s659_s4, 64 }
 0x27c   :  { %p542_p1 = scmp.ne.s32.totalorder %s659_s4, %s541_s5  ;;  %p545_p2 = scmp.lt.u32.totalorder %s541_s5, %s659_s4 }
 0x27e   :  { %p547_p3 = pnand %p545_p2, %p542_p1 }
 0x280   :  { %550 = shalt.err (!%p547_p3)
}
 0x281   :  { %325 = dma.vmem_to_hbm [thread:$0]  %s323_s27, 64, %s659_s4, [#allocation4]  }
 0x282   :  { %555 = dma.done.wait [#allocation4], 64  }
 0x283   :  { %556 = vsyncadd [#allocation4], 4294967232 }
 0x284   :  { %329 = vsyncpa [#allocation3], 1 }
 0x285   :  { %330 = vsyncpa [#allocation6], 1 }
 0x286   :  { %331 = vsyncpa [#allocation4], 1 }

</bundles_post_ra>
